<compile_context>
chip_gen: v6e
topology: v6e:2x2x1
jax: 0.10.0
libtpu: 0.0.40
codegen_flags: <defaults>
</compile_context>

<pallas_src>
import functools
import math

import jax
import jax.numpy as jnp
from jax.experimental import pallas as pl
from jax.experimental.pallas import tpu as pltpu


# ---------------------------------------------------------------------------
# Hardware-aware planning helpers
# ---------------------------------------------------------------------------

def _vmem_cap_bytes():
    """Physical VMEM capacity of the local TPU (falls back to the v7x 64 MiB floor)."""
    try:
        return int(pltpu.get_tpu_info().vmem_capacity_bytes)
    except Exception:
        return 64 << 20


def _num_tensorcores():
    """TensorCores per chip that a 'parallel' grid axis can usefully be sharded over."""
    try:
        kind = jax.devices()[0].device_kind.lower()
    except Exception:
        return 1
    # v2/v3/v5e/v6e expose a single TensorCore to Pallas; v4/v5p (megacore) and v7x have two.
    if ("v2" in kind) or ("v3" in kind) or ("v5 lite" in kind) or ("v5e" in kind) or ("v6" in kind):
        return 1
    return 2


def plan_queue_tile(Q, D, B, num_parallel=None, num_buffers=2, tq_cap=8192):
    """Pick the queue-tile size tq: a multiple of 128 that divides Q, as large as the
    VMEM budget allows (capped at tq_cap), leaving room for the parallel split."""
    # TODO(synk): ragged queues (Q not a multiple of 128) would need a padded/masked tail tile.
    assert Q % 128 == 0, Q
    if num_parallel is None:
        num_parallel = _num_tensorcores()
    num_parallel = max(1, min(num_parallel, Q // 128))

    budget = int(0.75 * _vmem_cap_bytes())
    # VMEM bytes per streamed queue column: double-buffered fused (2D, tq) bf16 bank tile
    # plus ~8 f32 rows of (B, tq) in-kernel intermediates (sims, p_t, exp terms).
    bytes_per_col = num_buffers * (2 * D) * 2 + 8 * B * 4
    tq_max = max(128, (min(tq_cap, budget // bytes_per_col) // 128) * 128)
    tq_max = min(tq_max, max(128, Q // num_parallel))

    best, t = 128, 128
    while t <= min(Q, tq_max):
        if Q % t == 0:
            best = t
        t += 128
    assert Q % best == 0, (Q, best)
    return best


# ---------------------------------------------------------------------------
# One-time data preparation (layout conversion / normalization)
# ---------------------------------------------------------------------------

def prepare_memory(mem_teacher, mem_student, tq):
    """One-time conversion of the two (Q, D) f32 memory banks into the kernel's streaming
    layout: a fused, grid-contiguous (NB, 2D, tq) bf16 array. Teacher occupies rows 0:D,
    student rows D:2D; block b holds queue columns [b*tq, (b+1)*tq). Each grid step's DMA
    is therefore one contiguous HBM region (no strided 2 KiB runs)."""
    mt = jnp.asarray(mem_teacher, jnp.float32)
    ms = jnp.asarray(mem_student, jnp.float32)
    Q, D = mt.shape
    assert ms.shape == (Q, D) and Q % tq == 0, (mt.shape, ms.shape, tq)
    fused = jnp.concatenate([mt.T, ms.T], axis=0).astype(jnp.bfloat16)   # (2D, Q)
    NB = Q // tq
    return fused.reshape(2 * D, NB, tq).transpose(1, 0, 2)               # (NB, 2D, tq)


def prepare_features(feats, T):
    """L2-normalize rows (Normalize(power=2)) and fold in the 1/T temperature; bf16."""
    x = jnp.asarray(feats, jnp.float32)
    x = x * jax.lax.rsqrt(jnp.sum(x * x, axis=-1, keepdims=True))
    return (x * jnp.float32(1.0 / T)).astype(jnp.bfloat16)


def _build_block_diag_lhs(t_scaled, s_scaled):
    """(2B, 2D) block-diagonal bf16 LHS: rows 0:B hold the teacher features in cols 0:D,
    rows B:2B hold the student features in cols D:2D (zeros elsewhere)."""
    B, D = t_scaled.shape
    lhs = jnp.zeros((2 * B, 2 * D), t_scaled.dtype)
    lhs = lhs.at[:B, :D].set(t_scaled)
    lhs = lhs.at[B:, D:].set(s_scaled)
    return lhs


# ---------------------------------------------------------------------------
# Kernel
# ---------------------------------------------------------------------------

def _compress_kernel(B, lhs_ref, bank_ref, o_mt, o_lt, o_att, o_ats, o_ms, o_ls):
    k = pl.program_id(1)

    # Output blocks are resident across the k (queue) axis -> use them as the accumulators.
    @pl.when(k == 0)
    def _():
        neg = jnp.full((B, 1), -jnp.inf, jnp.float32)
        zero = jnp.zeros((B, 1), jnp.float32)
        o_mt[0] = neg
        o_ms[0] = neg
        o_lt[0] = zero
        o_ls[0] = zero
        o_att[0] = zero
        o_ats[0] = zero

    # Single MXU matmul per tile: block-diagonal (2B, 2D) bf16 LHS x fused (2D, tq) bf16
    # bank tile -> (2B, tq) f32. Rows 0:B are teacher logits, rows B:2B student logits
    # (the 1/T temperature is already folded into the LHS).
    sim = jnp.dot(lhs_ref[...], bank_ref[0], preferred_element_type=jnp.float32)
    sim_t = sim[:B, :]
    sim_s = sim[B:, :]

    # Teacher online-softmax stats + running weighted sums E_{p_t}[sim_t], E_{p_t}[sim_s].
    m_prev = o_mt[0]
    m_new = jnp.maximum(m_prev, sim_t.max(-1, keepdims=True))
    alpha = jnp.exp(m_prev - m_new)
    p_t = jnp.exp(sim_t - m_new)
    o_lt[0] = alpha * o_lt[0] + p_t.sum(-1, keepdims=True)
    o_att[0] = alpha * o_att[0] + (p_t * sim_t).sum(-1, keepdims=True)
    o_ats[0] = alpha * o_ats[0] + (p_t * sim_s).sum(-1, keepdims=True)
    o_mt[0] = m_new

    # Student online logsumexp (log_softmax denominator).
    ms_prev = o_ms[0]
    ms_new = jnp.maximum(ms_prev, sim_s.max(-1, keepdims=True))
    o_ls[0] = (jnp.exp(ms_prev - ms_new) * o_ls[0]
               + jnp.exp(sim_s - ms_new).sum(-1, keepdims=True))
    o_ms[0] = ms_new


# ---------------------------------------------------------------------------
# Wrapper
# ---------------------------------------------------------------------------

def compress_loss(teacher_feats, student_feats, fused_banks, T=0.04, num_parallel=None):
    """CompReSS forward loss: KL(softmax(teacher sims) || softmax(student sims)), batchmean.
    `fused_banks` is the blocked bf16 (NB, 2D, tq) layout from prepare_memory()."""
    B, D = teacher_feats.shape
    NB, twoD, tq = fused_banks.shape
    assert twoD == 2 * D and student_feats.shape == (B, D)
    Q = NB * tq

    # Parallel split over TensorCores (1 on v5e/v6e, 2 on v7x); keep it even over NB.
    if num_parallel is None:
        num_parallel = _num_tensorcores()
    num_parallel = max(1, min(num_parallel, NB))
    while NB % num_parallel != 0:
        num_parallel -= 1
    nk = NB // num_parallel

    t = prepare_features(teacher_feats, T)
    s = prepare_features(student_feats, T)
    lhs = _build_block_diag_lhs(t, s)                      # (2B, 2D) bf16, resident in VMEM

    # Generation-aware VMEM limit: what the pipeline needs, capped below physical capacity.
    cap = _vmem_cap_bytes()
    bank_tile_bytes = 2 * D * tq * 2                       # one bf16 (2D, tq) buffer
    needed = 3 * bank_tile_bytes + lhs.size * 2 + 10 * B * tq * 4 + (2 << 20)
    vmem_limit = int(min(0.9 * cap, max(needed, 64 << 20)))

    stat_shape = jax.ShapeDtypeStruct((num_parallel, B, 1), jnp.float32)
    stat_spec = pl.BlockSpec((1, B, 1), lambda p, k: (p, 0, 0))

    cost = pl.CostEstimate(
        flops=int(2 * (2 * B) * (2 * D) * Q),
        transcendentals=int(3 * B * Q),
        bytes_accessed=int(fused_banks.size * 2 + lhs.size * 2 + 6 * num_parallel * B * 4),
    )

    stats = pl.pallas_call(
        functools.partial(_compress_kernel, B),
        out_shape=(stat_shape,) * 6,
        grid_spec=pltpu.PrefetchScalarGridSpec(
            num_scalar_prefetch=0,
            grid=(num_parallel, nk),
            in_specs=[
                # Tiny block-diagonal feature matrix: resident across the whole grid.
                pl.BlockSpec((2 * B, 2 * D), lambda p, k: (0, 0)),
                # Fused bank: one contiguous (2D, tq) bf16 block per step.
                # TODO(synk): sweep pipeline_mode=pl.Buffered(3) here once per-generation tuned.
                pl.BlockSpec((1, 2 * D, tq), lambda p, k: (p * nk + k, 0, 0)),
            ],
            out_specs=[stat_spec] * 6,
        ),
        compiler_params=pltpu.CompilerParams(
            dimension_semantics=("parallel", "arbitrary"),
            vmem_limit_bytes=vmem_limit,
        ),
        cost_estimate=cost,
    )(lhs, fused_banks)

    m_t, l_t, a_tt, a_ts, m_s, l_s = [x[..., 0] for x in stats]      # each (P, B)

    # Merge per-chunk online stats (tiny (P, B) work) and finish the batchmean KL.
    M_t = jnp.max(m_t, axis=0)
    w_t = jnp.exp(m_t - M_t[None, :])
    L_t = jnp.sum(l_t * w_t, axis=0)
    E_tt = jnp.sum(a_tt * w_t, axis=0) / L_t                         # E_{p_t}[sim_t]
    E_ts = jnp.sum(a_ts * w_t, axis=0) / L_t                         # E_{p_t}[sim_s]
    lse_t = M_t + jnp.log(L_t)
    M_s = jnp.max(m_s, axis=0)
    lse_s = M_s + jnp.log(jnp.sum(l_s * jnp.exp(m_s - M_s[None, :]), axis=0))

    kl_rows = (E_tt - lse_t) - (E_ts - lse_s)                        # per-row KL(p_t || p_s)
    return jnp.sum(kl_rows) / B


def update_memory(fused_banks, q_teacher, q_student, index):
    """Functional equivalent of SampleSimilarities' memory.index_copy_ on the fused,
    blocked bf16 layout. Batches are L2-normalized before insertion (as in the module).
    State glue only — the reference clones the queue before updating, so this does not
    affect the loss computed above."""
    NB, twoD, tq = fused_banks.shape
    D = twoD // 2
    Q = NB * tq
    B = q_teacher.shape[0]

    def l2norm(x):
        x = jnp.asarray(x, jnp.float32)
        return x * jax.lax.rsqrt(jnp.sum(x * x, axis=-1, keepdims=True))

    tn = l2norm(q_teacher).astype(fused_banks.dtype)                 # (B, D)
    sn = l2norm(q_student).astype(fused_banks.dtype)
    ids = (jnp.arange(B) + index) % Q
    blk = (ids // tq)[:, None]
    col = (ids % tq)[:, None]
    rows = jnp.arange(D)[None, :]
    fused_banks = fused_banks.at[blk, rows, col].set(tn)
    fused_banks = fused_banks.at[blk, D + rows, col].set(sn)
    return fused_banks, (index + B) % Q


# ---------------------------------------------------------------------------
# Reference (same quantized inputs, straight-line math) and demo
# ---------------------------------------------------------------------------

def _unblock_banks(fused_banks):
    NB, twoD, tq = fused_banks.shape
    D = twoD // 2
    flat = fused_banks.transpose(1, 0, 2).reshape(twoD, NB * tq)
    return flat[:D], flat[D:]                                        # (D, Q) teacher / student


def _reference_loss(t_scaled, s_scaled, fused_banks, batch):
    mem_t, mem_s = _unblock_banks(fused_banks)
    sim_t = jnp.dot(t_scaled.astype(jnp.float32), mem_t.astype(jnp.float32))
    sim_s = jnp.dot(s_scaled.astype(jnp.float32), mem_s.astype(jnp.float32))
    targets = jax.nn.softmax(sim_t, axis=1)
    log_inputs = jax.nn.log_softmax(sim_s, axis=1)
    return jnp.sum(targets * (jnp.log(targets) - log_inputs)) / batch


if __name__ == "__main__":
    # Small shapes consistent with the module (real module: queue_size=65536, T=0.04).
    B, D, Q, T = 8, 32, 256, 0.04

    key = jax.random.PRNGKey(0)
    k_t, k_s, k_mt, k_ms = jax.random.split(key, 4)

    teacher_feats = jax.random.normal(k_t, (B, D), dtype=jnp.float32)
    student_feats = jax.random.normal(k_s, (B, D), dtype=jnp.float32)

    # Memory bank init matches the module: uniform[0,1) * 2*stdv - stdv, stdv = 1/sqrt(D/3).
    stdv = 1.0 / math.sqrt(D / 3)
    mem_teacher = jax.random.uniform(k_mt, (Q, D), dtype=jnp.float32) * (2 * stdv) - stdv
    mem_student = jax.random.uniform(k_ms, (Q, D), dtype=jnp.float32) * (2 * stdv) - stdv

    # One-time conversion of the banks into the kernel's fused, blocked streaming layout;
    # the block size comes from the generation-aware VMEM budget.
    tq = plan_queue_tile(Q, D, B)
    fused_banks = prepare_memory(mem_teacher, mem_student, tq)

    loss = compress_loss(teacher_feats, student_feats, fused_banks, T=T)
    loss = jax.block_until_ready(loss)

    ref = _reference_loss(prepare_features(teacher_feats, T),
                          prepare_features(student_feats, T),
                          fused_banks, float(B))
    assert jnp.allclose(loss, ref, rtol=2e-3, atol=2e-3), (loss, ref)

    # Mirror the buffer-update side effect of SampleSimilarities.forward (state update only;
    # does not affect the loss computed above).
    fused_banks, _ = update_memory(fused_banks, teacher_feats, student_feats, 0)
    jax.block_until_ready(fused_banks)

    print("KERNEL_OK")
</pallas_src>

<mosaic_0001>
module attributes {stable_mosaic.version = 11 : i64} {
  func.func @_compress_kernel(%arg0: i32, %arg1: i32, %arg2: memref<16x64xbf16, #tpu.memory_space<vmem>>, %arg3: memref<1x64x128xbf16, #tpu.memory_space<vmem>>, %arg4: memref<1x8x1xf32, #tpu.memory_space<vmem>>, %arg5: memref<1x8x1xf32, #tpu.memory_space<vmem>>, %arg6: memref<1x8x1xf32, #tpu.memory_space<vmem>>, %arg7: memref<1x8x1xf32, #tpu.memory_space<vmem>>, %arg8: memref<1x8x1xf32, #tpu.memory_space<vmem>>, %arg9: memref<1x8x1xf32, #tpu.memory_space<vmem>>) attributes {dimension_semantics = [#tpu.dimension_semantics<parallel>, #tpu.dimension_semantics<arbitrary>], iteration_bounds = array<i64: 2, 1>, scalar_prefetch = 0 : i64, scratch_operands = 0 : i64, tpu.core_type = #tpu.core_type<tc>, window_params = [{pipeline_mode = #tpu.pipeline_mode<synchronous>, transform_indices = @transform_0, window_bounds = array<i64: 16, 64>}, {transform_indices = @transform_1, window_bounds = array<i64: 1, 64, 128>}, {transform_indices = @transform_2, window_bounds = array<i64: 1, 8, 1>}, {transform_indices = @transform_3, window_bounds = array<i64: 1, 8, 1>}, {transform_indices = @transform_4, window_bounds = array<i64: 1, 8, 1>}, {transform_indices = @transform_5, window_bounds = array<i64: 1, 8, 1>}, {transform_indices = @transform_6, window_bounds = array<i64: 1, 8, 1>}, {transform_indices = @transform_7, window_bounds = array<i64: 1, 8, 1>}]} {
    %c0_i32 = arith.constant 0 : i32
    %0 = arith.cmpi eq, %arg1, %c0_i32 : i32
    %1 = arith.extui %0 : i1 to i32
    %c0_i32_0 = arith.constant 0 : i32
    %2 = arith.cmpi ne, %1, %c0_i32_0 : i32
    scf.if %2 {
      %cst_47 = arith.constant 0xFF800000 : f32
      %73 = vector.broadcast %cst_47 : f32 to vector<8x1xf32>
      %cst_48 = arith.constant 0.000000e+00 : f32
      %74 = vector.broadcast %cst_48 : f32 to vector<8x1xf32>
      %c0_49 = arith.constant 0 : index
      %c0_50 = arith.constant 0 : index
      %c0_51 = arith.constant 0 : index
      %75 = vector.load %arg4[%c0_49, %c0_50, %c0_51] : memref<1x8x1xf32, #tpu.memory_space<vmem>>, vector<1x8x1xf32>
      %76 = vector.shape_cast %75 : vector<1x8x1xf32> to vector<8x1xf32>
      %77 = vector.shape_cast %73 : vector<8x1xf32> to vector<1x8x1xf32>
      tpu.vector_store %arg4[%c0_49, %c0_50, %c0_51], %77 {strides = array<i32>} : memref<1x8x1xf32, #tpu.memory_space<vmem>>, vector<1x8x1xf32>,
      %c0_52 = arith.constant 0 : index
      %c0_53 = arith.constant 0 : index
      %c0_54 = arith.constant 0 : index
      %78 = vector.load %arg8[%c0_52, %c0_53, %c0_54] : memref<1x8x1xf32, #tpu.memory_space<vmem>>, vector<1x8x1xf32>
      %79 = vector.shape_cast %78 : vector<1x8x1xf32> to vector<8x1xf32>
      %80 = vector.shape_cast %73 : vector<8x1xf32> to vector<1x8x1xf32>
      tpu.vector_store %arg8[%c0_52, %c0_53, %c0_54], %80 {strides = array<i32>} : memref<1x8x1xf32, #tpu.memory_space<vmem>>, vector<1x8x1xf32>,
      %c0_55 = arith.constant 0 : index
      %c0_56 = arith.constant 0 : index
      %c0_57 = arith.constant 0 : index
      %81 = vector.load %arg5[%c0_55, %c0_56, %c0_57] : memref<1x8x1xf32, #tpu.memory_space<vmem>>, vector<1x8x1xf32>
      %82 = vector.shape_cast %81 : vector<1x8x1xf32> to vector<8x1xf32>
      %83 = vector.shape_cast %74 : vector<8x1xf32> to vector<1x8x1xf32>
      tpu.vector_store %arg5[%c0_55, %c0_56, %c0_57], %83 {strides = array<i32>} : memref<1x8x1xf32, #tpu.memory_space<vmem>>, vector<1x8x1xf32>,
      %c0_58 = arith.constant 0 : index
      %c0_59 = arith.constant 0 : index
      %c0_60 = arith.constant 0 : index
      %84 = vector.load %arg9[%c0_58, %c0_59, %c0_60] : memref<1x8x1xf32, #tpu.memory_space<vmem>>, vector<1x8x1xf32>
      %85 = vector.shape_cast %84 : vector<1x8x1xf32> to vector<8x1xf32>
      %86 = vector.shape_cast %74 : vector<8x1xf32> to vector<1x8x1xf32>
      tpu.vector_store %arg9[%c0_58, %c0_59, %c0_60], %86 {strides = array<i32>} : memref<1x8x1xf32, #tpu.memory_space<vmem>>, vector<1x8x1xf32>,
      %c0_61 = arith.constant 0 : index
      %c0_62 = arith.constant 0 : index
      %c0_63 = arith.constant 0 : index
      %87 = vector.load %arg6[%c0_61, %c0_62, %c0_63] : memref<1x8x1xf32, #tpu.memory_space<vmem>>, vector<1x8x1xf32>
      %88 = vector.shape_cast %87 : vector<1x8x1xf32> to vector<8x1xf32>
      %89 = vector.shape_cast %74 : vector<8x1xf32> to vector<1x8x1xf32>
      tpu.vector_store %arg6[%c0_61, %c0_62, %c0_63], %89 {strides = array<i32>} : memref<1x8x1xf32, #tpu.memory_space<vmem>>, vector<1x8x1xf32>,
      %c0_64 = arith.constant 0 : index
      %c0_65 = arith.constant 0 : index
      %c0_66 = arith.constant 0 : index
      %90 = vector.load %arg7[%c0_64, %c0_65, %c0_66] : memref<1x8x1xf32, #tpu.memory_space<vmem>>, vector<1x8x1xf32>
      %91 = vector.shape_cast %90 : vector<1x8x1xf32> to vector<8x1xf32>
      %92 = vector.shape_cast %74 : vector<8x1xf32> to vector<1x8x1xf32>
      tpu.vector_store %arg7[%c0_64, %c0_65, %c0_66], %92 {strides = array<i32>} : memref<1x8x1xf32, #tpu.memory_space<vmem>>, vector<1x8x1xf32>,
    } else {
    }
    %c0 = arith.constant 0 : index
    %c0_1 = arith.constant 0 : index
    %3 = vector.load %arg2[%c0, %c0_1] : memref<16x64xbf16, #tpu.memory_space<vmem>>, vector<16x64xbf16>
    %c0_2 = arith.constant 0 : index
    %c0_3 = arith.constant 0 : index
    %c0_4 = arith.constant 0 : index
    %4 = vector.load %arg3[%c0_2, %c0_3, %c0_4] : memref<1x64x128xbf16, #tpu.memory_space<vmem>>, vector<1x64x128xbf16>
    %5 = vector.shape_cast %4 : vector<1x64x128xbf16> to vector<64x128xbf16>
    %cst = arith.constant dense<0.000000e+00> : vector<16x128xf32>
    %6 = tpu.matmul %3, %5, %cst {dimension_numbers = #tpu.dot_dimension_numbers<[1], [0], [0], [1], [0, 0, 1, 1], [], []>} : vector<16x64xbf16>, vector<64x128xbf16>, vector<16x128xf32> -> vector<16x128xf32>
    %7 = vector.extract_strided_slice %6 {offsets = [0, 0], sizes = [8, 128], strides = [1, 1]} : vector<16x128xf32> to vector<8x128xf32>
    %8 = vector.extract_strided_slice %6 {offsets = [8, 0], sizes = [8, 128], strides = [1, 1]} : vector<16x128xf32> to vector<8x128xf32>
    %c0_5 = arith.constant 0 : index
    %c0_6 = arith.constant 0 : index
    %c0_7 = arith.constant 0 : index
    %9 = vector.load %arg4[%c0_5, %c0_6, %c0_7] : memref<1x8x1xf32, #tpu.memory_space<vmem>>, vector<1x8x1xf32>
    %10 = vector.shape_cast %9 : vector<1x8x1xf32> to vector<8x1xf32>
    %cst_8 = arith.constant dense<0xFF800000> : vector<8xf32>
    %11 = vector.multi_reduction <maximumf>, %7, %cst_8 [1] : vector<8x128xf32> to vector<8xf32>
    %12 = vector.shape_cast %11 : vector<8xf32> to vector<8x1xf32>
    %13 = arith.maximumf %10, %12 : vector<8x1xf32>
    %14 = arith.subf %10, %13 : vector<8x1xf32>
    %15 = math.exp %14 : vector<8x1xf32>
    %16 = vector.broadcast %13 : vector<8x1xf32> to vector<8x128xf32>
    %17 = arith.subf %7, %16 : vector<8x128xf32>
    %18 = math.exp %17 : vector<8x128xf32>
    %c0_9 = arith.constant 0 : index
    %c0_10 = arith.constant 0 : index
    %c0_11 = arith.constant 0 : index
    %19 = vector.load %arg5[%c0_9, %c0_10, %c0_11] : memref<1x8x1xf32, #tpu.memory_space<vmem>>, vector<1x8x1xf32>
    %20 = vector.shape_cast %19 : vector<1x8x1xf32> to vector<8x1xf32>
    %21 = arith.mulf %15, %20 : vector<8x1xf32>
    %cst_12 = arith.constant dense<0.000000e+00> : vector<8xf32>
    %22 = vector.multi_reduction <add>, %18, %cst_12 [1] : vector<8x128xf32> to vector<8xf32>
    %23 = vector.shape_cast %22 : vector<8xf32> to vector<8x1xf32>
    %24 = arith.addf %21, %23 : vector<8x1xf32>
    %c0_13 = arith.constant 0 : index
    %c0_14 = arith.constant 0 : index
    %c0_15 = arith.constant 0 : index
    %25 = vector.load %arg5[%c0_13, %c0_14, %c0_15] : memref<1x8x1xf32, #tpu.memory_space<vmem>>, vector<1x8x1xf32>
    %26 = vector.shape_cast %25 : vector<1x8x1xf32> to vector<8x1xf32>
    %27 = vector.shape_cast %24 : vector<8x1xf32> to vector<1x8x1xf32>
    tpu.vector_store %arg5[%c0_13, %c0_14, %c0_15], %27 {strides = array<i32>} : memref<1x8x1xf32, #tpu.memory_space<vmem>>, vector<1x8x1xf32>,
    %c0_16 = arith.constant 0 : index
    %c0_17 = arith.constant 0 : index
    %c0_18 = arith.constant 0 : index
    %28 = vector.load %arg6[%c0_16, %c0_17, %c0_18] : memref<1x8x1xf32, #tpu.memory_space<vmem>>, vector<1x8x1xf32>
    %29 = vector.shape_cast %28 : vector<1x8x1xf32> to vector<8x1xf32>
    %30 = arith.mulf %15, %29 : vector<8x1xf32>
    %31 = arith.mulf %18, %7 : vector<8x128xf32>
    %cst_19 = arith.constant dense<0.000000e+00> : vector<8xf32>
    %32 = vector.multi_reduction <add>, %31, %cst_19 [1] : vector<8x128xf32> to vector<8xf32>
    %33 = vector.shape_cast %32 : vector<8xf32> to vector<8x1xf32>
    %34 = arith.addf %30, %33 : vector<8x1xf32>
    %c0_20 = arith.constant 0 : index
    %c0_21 = arith.constant 0 : index
    %c0_22 = arith.constant 0 : index
    %35 = vector.load %arg6[%c0_20, %c0_21, %c0_22] : memref<1x8x1xf32, #tpu.memory_space<vmem>>, vector<1x8x1xf32>
    %36 = vector.shape_cast %35 : vector<1x8x1xf32> to vector<8x1xf32>
    %37 = vector.shape_cast %34 : vector<8x1xf32> to vector<1x8x1xf32>
    tpu.vector_store %arg6[%c0_20, %c0_21, %c0_22], %37 {strides = array<i32>} : memref<1x8x1xf32, #tpu.memory_space<vmem>>, vector<1x8x1xf32>,
    %c0_23 = arith.constant 0 : index
    %c0_24 = arith.constant 0 : index
    %c0_25 = arith.constant 0 : index
    %38 = vector.load %arg7[%c0_23, %c0_24, %c0_25] : memref<1x8x1xf32, #tpu.memory_space<vmem>>, vector<1x8x1xf32>
    %39 = vector.shape_cast %38 : vector<1x8x1xf32> to vector<8x1xf32>
    %40 = arith.mulf %15, %39 : vector<8x1xf32>
    %41 = arith.mulf %18, %8 : vector<8x128xf32>
    %cst_26 = arith.constant dense<0.000000e+00> : vector<8xf32>
    %42 = vector.multi_reduction <add>, %41, %cst_26 [1] : vector<8x128xf32> to vector<8xf32>
    %43 = vector.shape_cast %42 : vector<8xf32> to vector<8x1xf32>
    %44 = arith.addf %40, %43 : vector<8x1xf32>
    %c0_27 = arith.constant 0 : index
    %c0_28 = arith.constant 0 : index
    %c0_29 = arith.constant 0 : index
    %45 = vector.load %arg7[%c0_27, %c0_28, %c0_29] : memref<1x8x1xf32, #tpu.memory_space<vmem>>, vector<1x8x1xf32>
    %46 = vector.shape_cast %45 : vector<1x8x1xf32> to vector<8x1xf32>
    %47 = vector.shape_cast %44 : vector<8x1xf32> to vector<1x8x1xf32>
    tpu.vector_store %arg7[%c0_27, %c0_28, %c0_29], %47 {strides = array<i32>} : memref<1x8x1xf32, #tpu.memory_space<vmem>>, vector<1x8x1xf32>,
    %c0_30 = arith.constant 0 : index
    %c0_31 = arith.constant 0 : index
    %c0_32 = arith.constant 0 : index
    %48 = vector.load %arg4[%c0_30, %c0_31, %c0_32] : memref<1x8x1xf32, #tpu.memory_space<vmem>>, vector<1x8x1xf32>
    %49 = vector.shape_cast %48 : vector<1x8x1xf32> to vector<8x1xf32>
    %50 = vector.shape_cast %13 : vector<8x1xf32> to vector<1x8x1xf32>
    tpu.vector_store %arg4[%c0_30, %c0_31, %c0_32], %50 {strides = array<i32>} : memref<1x8x1xf32, #tpu.memory_space<vmem>>, vector<1x8x1xf32>,
    %c0_33 = arith.constant 0 : index
    %c0_34 = arith.constant 0 : index
    %c0_35 = arith.constant 0 : index
    %51 = vector.load %arg8[%c0_33, %c0_34, %c0_35] : memref<1x8x1xf32, #tpu.memory_space<vmem>>, vector<1x8x1xf32>
    %52 = vector.shape_cast %51 : vector<1x8x1xf32> to vector<8x1xf32>
    %cst_36 = arith.constant dense<0xFF800000> : vector<8xf32>
    %53 = vector.multi_reduction <maximumf>, %8, %cst_36 [1] : vector<8x128xf32> to vector<8xf32>
    %54 = vector.shape_cast %53 : vector<8xf32> to vector<8x1xf32>
    %55 = arith.maximumf %52, %54 : vector<8x1xf32>
    %56 = arith.subf %52, %55 : vector<8x1xf32>
    %57 = math.exp %56 : vector<8x1xf32>
    %c0_37 = arith.constant 0 : index
    %c0_38 = arith.constant 0 : index
    %c0_39 = arith.constant 0 : index
    %58 = vector.load %arg9[%c0_37, %c0_38, %c0_39] : memref<1x8x1xf32, #tpu.memory_space<vmem>>, vector<1x8x1xf32>
    %59 = vector.shape_cast %58 : vector<1x8x1xf32> to vector<8x1xf32>
    %60 = arith.mulf %57, %59 : vector<8x1xf32>
    %61 = vector.broadcast %55 : vector<8x1xf32> to vector<8x128xf32>
    %62 = arith.subf %8, %61 : vector<8x128xf32>
    %63 = math.exp %62 : vector<8x128xf32>
    %cst_40 = arith.constant dense<0.000000e+00> : vector<8xf32>
    %64 = vector.multi_reduction <add>, %63, %cst_40 [1] : vector<8x128xf32> to vector<8xf32>
    %65 = vector.shape_cast %64 : vector<8xf32> to vector<8x1xf32>
    %66 = arith.addf %60, %65 : vector<8x1xf32>
    %c0_41 = arith.constant 0 : index
    %c0_42 = arith.constant 0 : index
    %c0_43 = arith.constant 0 : index
    %67 = vector.load %arg9[%c0_41, %c0_42, %c0_43] : memref<1x8x1xf32, #tpu.memory_space<vmem>>, vector<1x8x1xf32>
    %68 = vector.shape_cast %67 : vector<1x8x1xf32> to vector<8x1xf32>
    %69 = vector.shape_cast %66 : vector<8x1xf32> to vector<1x8x1xf32>
    tpu.vector_store %arg9[%c0_41, %c0_42, %c0_43], %69 {strides = array<i32>} : memref<1x8x1xf32, #tpu.memory_space<vmem>>, vector<1x8x1xf32>,
    %c0_44 = arith.constant 0 : index
    %c0_45 = arith.constant 0 : index
    %c0_46 = arith.constant 0 : index
    %70 = vector.load %arg8[%c0_44, %c0_45, %c0_46] : memref<1x8x1xf32, #tpu.memory_space<vmem>>, vector<1x8x1xf32>
    %71 = vector.shape_cast %70 : vector<1x8x1xf32> to vector<8x1xf32>
    %72 = vector.shape_cast %55 : vector<8x1xf32> to vector<1x8x1xf32>
    tpu.vector_store %arg8[%c0_44, %c0_45, %c0_46], %72 {strides = array<i32>} : memref<1x8x1xf32, #tpu.memory_space<vmem>>, vector<1x8x1xf32>,
    return
  }
  func.func @transform_0(%arg0: i32, %arg1: i32) -> (i32, i32) {
    %c0_i32 = arith.constant 0 : i32
    %c0_i32_0 = arith.constant 0 : i32
    %c0_i32_1 = arith.constant 0 : i32
    return %c0_i32, %c0_i32_0 : i32, i32
  }
  func.func @transform_1(%arg0: i32, %arg1: i32) -> (i32, i32, i32) {
    %c1_i32 = arith.constant 1 : i32
    %0 = arith.muli %arg0, %c1_i32 : i32
    %1 = arith.addi %0, %arg1 : i32
    %c0_i32 = arith.constant 0 : i32
    %c0_i32_0 = arith.constant 0 : i32
    %c0_i32_1 = arith.constant 0 : i32
    return %1, %c0_i32, %c0_i32_0 : i32, i32, i32
  }
  func.func @transform_2(%arg0: i32, %arg1: i32) -> (i32, i32, i32) {
    %c0_i32 = arith.constant 0 : i32
    %c0_i32_0 = arith.constant 0 : i32
    %c0_i32_1 = arith.constant 0 : i32
    return %arg0, %c0_i32, %c0_i32_0 : i32, i32, i32
  }
  func.func @transform_3(%arg0: i32, %arg1: i32) -> (i32, i32, i32) {
    %c0_i32 = arith.constant 0 : i32
    %c0_i32_0 = arith.constant 0 : i32
    %c0_i32_1 = arith.constant 0 : i32
    return %arg0, %c0_i32, %c0_i32_0 : i32, i32, i32
  }
  func.func @transform_4(%arg0: i32, %arg1: i32) -> (i32, i32, i32) {
    %c0_i32 = arith.constant 0 : i32
    %c0_i32_0 = arith.constant 0 : i32
    %c0_i32_1 = arith.constant 0 : i32
    return %arg0, %c0_i32, %c0_i32_0 : i32, i32, i32
  }
  func.func @transform_5(%arg0: i32, %arg1: i32) -> (i32, i32, i32) {
    %c0_i32 = arith.constant 0 : i32
    %c0_i32_0 = arith.constant 0 : i32
    %c0_i32_1 = arith.constant 0 : i32
    return %arg0, %c0_i32, %c0_i32_0 : i32, i32, i32
  }
  func.func @transform_6(%arg0: i32, %arg1: i32) -> (i32, i32, i32) {
    %c0_i32 = arith.constant 0 : i32
    %c0_i32_0 = arith.constant 0 : i32
    %c0_i32_1 = arith.constant 0 : i32
    return %arg0, %c0_i32, %c0_i32_0 : i32, i32, i32
  }
  func.func @transform_7(%arg0: i32, %arg1: i32) -> (i32, i32, i32) {
    %c0_i32 = arith.constant 0 : i32
    %c0_i32_0 = arith.constant 0 : i32
    %c0_i32_1 = arith.constant 0 : i32
    return %arg0, %c0_i32, %c0_i32_0 : i32, i32, i32
  }
}

</mosaic_0001>

<bundles_post_ra>
// kernel: tpu_custom_call.1
= control target key start
LH: loop header
LB: loop body
LE: loop exit
PB: predicated region body
PF: predicated region fallthrough
CT: control target
= control target key end

     0   :  { %13 = vsyncpa [#allocation3], 0  ;;  %s1237_s0 = inlined_call_operand.hbm [shape: bf16[16,64], index: 0, kind: input, shape index: {}]   ;;  %s1238_s1 = inlined_call_operand.hbm [shape: bf16[2,64,128], index: 1, kind: input, shape index: {}]   ;;  %s1239_s2 = inlined_call_operand.vmem [shape: f32[2,8,1], index: 2, kind: output, shape index: {0}]   ;;  %s1240_s3 = inlined_call_operand.vmem [shape: f32[2,8,1], index: 3, kind: output, shape index: {1}]   ;;  %s1241_s4 = inlined_call_operand.vmem [shape: f32[2,8,1], index: 4, kind: output, shape index: {2}]   ;;  %s1242_s5 = inlined_call_operand.vmem [shape: f32[2,8,1], index: 5, kind: output, shape index: {3}]   ;;  %s1243_s6 = inlined_call_operand.vmem [shape: f32[2,8,1], index: 6, kind: output, shape index: {4}]   ;;  %s1244_s7 = inlined_call_operand.vmem [shape: f32[2,8,1], index: 7, kind: output, shape index: {5}]  }
   0x1   :  { %14 = vsyncpa [#allocation5], 0 }
   0x2   :  { %16 = vsyncpa [#allocation5 + $0x1], 0  ;;  %s1063_s24 = smov 0   ;;  %s1065_s25 = smov 0  }
   0x3   :  { %s1067_s26 = smov 0   ;;  %s1069_s27 = smov 0  }
   0x4   :  { %s1071_s28 = smov 0   ;;  %s1073_s29 = smov 0  }
   0x5 LB: > { %s775_s30 = sadd.s32 4294967295, %s1013_s29   ;;  %p77_p0 = scmp.ne.s32.totalorder %s997_s25, %s993_s24  ;;  %s1013_s29 = sphi %s1073_s29, %s22_s29   ;;  %s1009_s28 = sphi %s1071_s28, %s1258_s28   ;;  %s1005_s27 = sphi %s1069_s27, %s1257_s27   ;;  %s1001_s26 = sphi %s1067_s26, %s1256_s26   ;;  %s997_s25 = sphi %s1065_s25, %s1255_s25   ;;  %s993_s24 = sphi %s1063_s24, %s1254_s24  }
   0x6   : > { %p1093_p1 = scmp.eq.s32.totalorder %s775_s30, 0  ;;  %p777_p2 = scmp.ge.s32.totalorder %s1013_s29, 1 }
   0x7   : > { %p244_p3 = scmp.lt.s32.totalorder %s1013_s29, 3  ;;  %s1015_s11 = smov [#allocation2]  }
   0x8   : > { %p1101_p4 = por %p1093_p1, %p77_p0  ;;  %s256_s12 = sshll.u32 %s1015_s11, 4  ;;  %s257_s12 = int_to_ptr.vmem [resolvable:$true] %s256_s12 }
   0x9   : > { %p1105_p5 = pnand %p777_p2, %p244_p3  ;;  %s34_s14 = sadd.s32 1, %s1009_s28 }
   0xa   : > { %s916_s15 = scalar_lea.vmem %s257_s12, 128  ;;  %p924_p12 = scmp.lt.s32.totalorder %s257_s12, %s257_s12 }
   0xb   : > { %p824_p6 = pneg %p1105_p5  ;;  %p917_p9 = scmp.ne.s32.totalorder %s257_s12, %s916_s15 }
   0xc   : > { %p925_p13 = scmp.lt.s32.totalorder %s916_s15, %s916_s15 }
   0xd   : > { %p1113_p7 = pnand %p824_p6, %p1093_p1 }
   0xe   : > { %p926_p0 = por %p925_p13, %p924_p12 }
   0xf   : > { %p907_p8 = pneg %p1113_p7 }
  0x11   : > { %p919_p10 = pnand %p917_p9, %p907_p8 }
  0x13   : > { %p920_p11 = pneg %p919_p10 }
  0x15   : > { %p927_p2 = pnand %p926_p0, %p920_p11 }
  0x17   : > { %930 = shalt.err (!%p927_p2)
}
  0x18   : > { %s1245_s16 = smov 64   ;;  %s1246_s17 = smov 4  }
  0x19   : > { %827 = dma.hbm_to_vmem [thread:$0]  (!%p1113_p7), %s1237_s0, 128, %s257_s12, [#allocation3], %s1245_s16, %s1245_s16, %s1246_s17  }
  0x1a   : > { %p36_p3 = scmp.ge.s32.totalorder %s34_s14, 2  ;;  %s64_s20 = sadd.s32 1, %s1001_s26 }
  0x1b   : > { %p71_p6 = scmp.ne.s32.totalorder %s1001_s26, %s997_s25  ;;  %p72_p8 = scmp.eq.s32.totalorder %s1013_s29, 0 }
  0x1c   : > { %s1260_s14 = smov (%p36_p3, %s34_s14), 0  ;;  %p833_p10 = scmp.lt.s32.totalorder %s1013_s29, 2 }
  0x1d   : > { %p73_p9 = por %p72_p8, %p71_p6  ;;  %s61_s21 = ssub.s32 %s1009_s28, %s1260_s14 }
  0x1e   : > { %s270_s22 = sand.u32 1, %s1001_s26   ;;  %p62_p11 = scmp.eq.s32.totalorder %s61_s21, 0 }
  0x1f   : > { %s780_s23 = sshll.u32 %s270_s22, 5  ;;  %s800_s24 = sshll.u32 %s1009_s28, 9 }
  0x20   : > { %s1140_s30 = scalar_select %p62_p11, %s1001_s26, %s64_s20  }
  0x21   : > { %s281_s12 = scalar_lea.hbm %s1238_s1, %s800_s24  ;;  %s274_s15 = scalar_lea.vmem [#allocation4], %s780_s23 }
  0x22   : > { %s282_s18 = sshll.u32 %s274_s15, 4  ;;  %p1145_p7 = pnand %p833_p10, %p73_p9  ;;  %s283_s18 = int_to_ptr.vmem [resolvable:$true] %s282_s18 }
  0x23   : > { %s271_s16 = scalar_lea.sflag [#allocation5], %s270_s22  ;;  %s944_s21 = scalar_lea.vmem %s283_s18, 512 }
  0x24   : > { %p933_p12 = pneg %p1145_p7  ;;  %p945_p13 = scmp.ne.s32.totalorder %s283_s18, %s944_s21 }
  0x25   : > { %s1018_s20 = smov [#allocation4]  }
  0x26   : > { %p947_p0 = pnand %p945_p13, %p933_p12  ;;  %s949_s17 = sshll.u32 %s1018_s20, 4  ;;  %s950_s17 = int_to_ptr.vmem [resolvable:$false] %s949_s17 }
  0x27   : > { %s951_s11 = scalar_lea.vmem %s950_s17, 1024  ;;  %p952_p3 = scmp.lt.s32.totalorder %s283_s18, %s950_s17 }
  0x28   : > { %p948_p2 = pneg %p947_p0  ;;  %p953_p6 = scmp.lt.s32.totalorder %s951_s11, %s944_s21 }
  0x2a   : > { %p954_p8 = por %p953_p6, %p952_p3 }
  0x2c   : > { %p955_p9 = pnand %p954_p8, %p948_p2 }
  0x2e   : > { %958 = shalt.err (!%p955_p9)
}
  0x2f   : > { %s1252_s23 = smov 4   ;;  %s1253_s24 = smov 64  }
  0x30   : > { %831 = dma.hbm_to_vmem [thread:$0]  (!%p1145_p7), %s281_s12, 512, %s283_s18, %s271_s16, %s1253_s24, %s1253_s24, %s1252_s23  }
  0x31   : > { %294 = sbr.rel (%p1105_p5) target bundleno = 700 (0x2bc), region = 28 }
  0x36   : > { %984 = dma.done.wait (%p1093_p1), [#allocation3], 128  }
  0x37   : > { %986 = vsyncadd (%p1093_p1), [#allocation3], 4294967168  ;;  %s300_s17 = sand.u32 1, %s997_s25  }
  0x38   : > { %s785_s22 = sshll.u32 %s300_s17, 5  ;;  %s301_s13 = scalar_lea.sflag [#allocation5], %s300_s17 }
  0x39   : > { %s304_s15 = scalar_lea.vmem [#allocation4], %s785_s22 }
  0x3a   : > { %988 = dma.done.wait (%p1101_p4), %s301_s13, 512  }
  0x3b   : > { %990 = vsyncadd (%p1101_p4), %s301_s13, 4294966784  ;;  %v1019_v0 = vmov 0.0   ;;  %vm1020_vm0 = vmmov 0   ;;  %v892_v1 = vld [vmem:[%s304_s15 + $0x18] sm:$0xff]   ;;  %v893_v2 = vld [vmem:[%s304_s15 + $0x10] sm:$0xff]   ;;  %vm430_vm1 = vcmask 523264  }
  0x3c   : > { %806 = vmatprep.subr.bf16.mxu0 %v1019_v0  ;;  %814 = vmatprep.mubr.msk.bf16.mxu0 %vm1020_vm0, %v1019_v0  ;;  %v894_v3 = vld [vmem:[%s304_s15 + $0x8] sm:$0xff]   ;;  %v895_v4 = vld [vmem:[%s304_s15] sm:$0xff]   ;;  %v896_v5 = vld [vmem:[#allocation2] sm:$0xff]   ;;  %p355_p1 = scmp.lt.s32.totalorder %s1005_s27, 1  ;;  %vm384_vm2 = vcmask 7168   ;;  %v1021_v6 = vmov -inf  }
  0x3d   : > { %807 = vmatpush3.bf16.msra.mxu0 %v892_v1  ;;  %v1022_v11 = vmov 0  }
  0x3e   : > { %808 = vmatprep.subr.bf16.mxu0 %v1019_v0  ;;  %s1262_s27 = smov (!%p355_p1, %s1005_s27), 1  ;;  %890 = vset.pattern.permute.xlu1 %v1022_v11 }
  0x3f   : > { %s786_s8 = sshll.u32 %s1262_s27, 3  ;;  %891 = vset.pattern.permute.xlu0 %v1022_v11 }
  0x40   : > { %s358_s16 = scalar_lea.vmem %s1239_s2, %s786_s8  ;;  %s374_s19 = scalar_lea.vmem %s1243_s6, %s786_s8 }
  0x41   : > { %809 = vmatpush3.bf16.msra.mxu0 %v893_v2  ;;  %385 = vst.msk [vmem:[%s358_s16] sm:$0xff] %vm384_vm2, %v1021_v6  ;;  %386 = vst.msk [vmem:[%s374_s19] sm:$0xff] %vm384_vm2, %v1021_v6  ;;  %s1180_s20 = scalar_lea.vmem %s1240_s3, %s786_s8  ;;  %s1185_s24 = scalar_lea.vmem %s1241_s4, %s786_s8 }
  0x42   : > { %810 = vmatprep.subr.bf16.mxu0 %v1019_v0  ;;  %387 = vst.msk [vmem:[%s1180_s20] sm:$0xff] %vm384_vm2, %v1019_v0  ;;  %389 = vst.msk [vmem:[%s1185_s24] sm:$0xff] %vm384_vm2, %v1019_v0  ;;  %s1194_s13 = scalar_lea.vmem %s1242_s5, %s786_s8  ;;  %s1201_s10 = scalar_lea.vmem %s1244_s7, %s786_s8 }
  0x43   : > { %390 = vst.msk [vmem:[%s1194_s13] sm:$0xff] %vm384_vm2, %v1019_v0  ;;  %388 = vst.msk [vmem:[%s1201_s10] sm:$0xff] %vm384_vm2, %v1019_v0 }
  0x45   : > { %811 = vmatpush3.bf16.msra.mxu0 %v894_v3 }
  0x46   : > { %812 = vmatprep.subr.bf16.mxu0 %v1019_v0 }
  0x48   : > { %v475_v12 = vld [vmem:[%s358_s16] sm:$0xff] }
  0x49   : > { %813 = vmatpush3.bf16.msra.mxu0 %v895_v4  ;;  %v512_v15 = vld [vmem:[%s374_s19] sm:$0xff] }
  0x4a   : > { %v490_v33 = vld [vmem:[%s1180_s20] sm:$0xff] }
  0x4b   : > { %v497_v34 = vld [vmem:[%s1185_s24] sm:$0xff] }
  0x4c   : > { %815 = vmatmul.mubr.msk.bf16.vlgmr.msra.gmra.mxu0 %vm430_vm1, %v896_v5  ;;  %v504_v37 = vld [vmem:[%s1194_s13] sm:$0xff] }
  0x4d   : > { %v519_v45 = vld [vmem:[%s1201_s10] sm:$0xff] }
 0x10c   : > { %v468_v7 = vpop.f32.mrf.mxu0 }
 0x10d   : > { %476 = vmax.xlane.f32.xlu0 %v468_v7 }
 0x10e   : > { %v816_v8 = vpop.f32.mrf.mxu0 }
 0x110   : > { %v471_v9 = vpop.f32.mrf.mxu0 }
 0x111   : > { %513 = vmax.xlane.f32.xlu0 %v471_v9 }
 0x112   : > { %v817_v10 = vpop.f32.mrf.mxu0 }
 0x196   : > { %v477_v13 = vpop.xlane.xlu0 %476 }
 0x197   : > { %v478_v14 = vmax.f32 %v475_v12, %v477_v13 }
 0x199   : > { %v479_v16 = vsub.f32 %v475_v12, %v478_v14  ;;  %511 = vst.msk [vmem:[%s358_s16] sm:$0xff] %vm384_vm2, %v478_v14  ;;  %484 = vperm.xlu1 %890, %v478_v14  }
 0x19a   : > { %v514_v17 = vpop.xlane.xlu0 %513 }
 0x19b   : > { %v515_v18 = vmax.f32 %v512_v15, %v514_v17  ;;  %v480_v30 = vmul.f32 1.442695, %v479_v16 }
 0x19d   : > { %v516_v19 = vsub.f32 %v512_v15, %v515_v18  ;;  %533 = vst.msk [vmem:[%s374_s19] sm:$0xff] %vm384_vm2, %v515_v18  ;;  %523 = vperm.xlu1 %890, %v515_v18  }
 0x19f   : > { %v517_v31 = vmul.f32 1.442695, %v516_v19 }
 0x214   : > { %v485_v20 = vpop.permute.xlu1 %484 }
 0x215   : > { %v487_v21 = vsub.f32 %v468_v7, %v485_v20 }
 0x217   : > { %v488_v22 = vmul.f32 1.442695, %v487_v21 }
 0x218   : > { %v524_v23 = vpop.permute.xlu1 %523 }
 0x219   : > { %897 = vpow2.f32 %v488_v22  ;;  %v526_v24 = vsub.f32 %v471_v9, %v524_v23 }
 0x21b   : > { %v527_v25 = vmul.f32 1.442695, %v526_v24 }
 0x21d   : > { %899 = vpow2.f32 %v527_v25 }
 0x21e   : > { %901 = vpow2.f32 %v480_v30 }
 0x21f   : > { %903 = vpow2.f32 %v517_v31 }
 0x226   : > { %v898_v26 = vpop.eup %897 }
 0x227   : > { %492 = vadd.xlane.f32.xlu0 %v898_v26  ;;  %v499_v27 = vmul.f32 %v898_v26, %v468_v7  ;;  %v506_v28 = vmul.f32 %v898_v26, %v471_v9 }
 0x229   : > { %500 = vadd.xlane.f32.xlu1 %v499_v27 }
 0x22a   : > { %v900_v29 = vpop.eup %899 }
 0x22b   : > { %507 = vadd.xlane.f32.xlu0 %v506_v28  ;;  %v902_v32 = vpop.eup %901 }
 0x22c   : > { %v491_v35 = vmul.f32 %v902_v32, %v490_v33  ;;  %v498_v39 = vmul.f32 %v902_v32, %v497_v34  ;;  %v505_v42 = vmul.f32 %v902_v32, %v504_v37  ;;  %v904_v43 = vpop.eup %903 }
 0x22d   : > { %v520_v47 = vmul.f32 %v904_v43, %v519_v45 }
 0x22f   : > { %529 = vadd.xlane.f32.xlu0 %v900_v29 }
 0x2b0   : > { %v493_v36 = vpop.xlane.xlu0 %492 }
 0x2b1   : > { %v494_v38 = vadd.f32 %v493_v36, %v491_v35 }
 0x2b2   : > { %v501_v40 = vpop.xlane.xlu1 %500 }
 0x2b3   : > { %496 = vst.msk [vmem:[%s1180_s20] sm:$0xff] %vm384_vm2, %v494_v38  ;;  %v502_v41 = vadd.f32 %v501_v40, %v498_v39 }
 0x2b4   : > { %v508_v44 = vpop.xlane.xlu0 %507 }
 0x2b5   : > { %503 = vst.msk [vmem:[%s1185_s24] sm:$0xff] %vm384_vm2, %v502_v41  ;;  %v509_v46 = vadd.f32 %v508_v44, %v505_v42 }
 0x2b7   : > { %510 = vst.msk [vmem:[%s1194_s13] sm:$0xff] %vm384_vm2, %v509_v46 }
 0x2b8   : > { %v530_v48 = vpop.xlane.xlu0 %529 }
 0x2b9   : > { %v531_v49 = vadd.f32 %v530_v48, %v520_v47 }
 0x2bb   : > { %532 = vst.msk [vmem:[%s1201_s10] sm:$0xff] %vm384_vm2, %v531_v49 }
 0x2bc PF: > { %s22_s29 = sadd.s32 1, %s1013_s29   ;;  %s1254_s24 = smov %s997_s25 }
 0x2bd   : > { %p19_p4 = scmp.ge.s32.totalorder %s22_s29, 4   ;;  %s1255_s25 = smov %s1001_s26 }
 0x2be   : > { %s1256_s26 = smov %s1140_s30  ;;  %s1257_s27 = smov %s1009_s28 }
 0x2bf   : > { %s1258_s28 = smov %s1260_s14  ;;  %21 = sbr.rel (!%p19_p4) target bundleno = 5 (0x5), region = 137 }
 0x2c4   :  { %623 = vsyncpa [#allocation3], 1 }
 0x2c5   :  { %625 = vsyncpa [#allocation3 + $0x1], 1 }
 0x2c6   :  { %626 = vsyncpa [#allocation5], 1 }
 0x2c7   :  { %628 = vsyncpa [#allocation5 + $0x1], 1 }

</bundles_post_ra>
